<compile_context>
chip_gen: v7x
topology: tpu7x:2x2x1
jax: 0.10.0
libtpu: 0.0.40
codegen_flags: <defaults>
</compile_context>

<pallas_src>
import jax
import jax.numpy as jnp
from jax.experimental import pallas as pl
from jax.experimental.pallas import tpu as pltpu


def _round_up(x: int, m: int) -> int:
    return ((x + m - 1) // m) * m


def _accuracy_kernel(y_hat_ref, labels_ref, out_ref):
    """Grid = (parallel_chunk p, batch_tile t, model m); out block resident per p."""
    t = pl.program_id(1)
    m = pl.program_id(2)

    @pl.when(jnp.logical_and(t == 0, m == 0))
    def _init():
        out_ref[...] = jnp.zeros_like(out_ref)

    logits = y_hat_ref[...]                       # [tile_b, O], native dtype
    labels = labels_ref[...]                      # [tile_b, 1] int32
    n_classes = logits.shape[-1]

    # First-occurrence argmax over the class (lane) axis.
    max_val = jnp.max(logits, axis=-1, keepdims=True)                 # [tile_b, 1]
    col = jax.lax.broadcasted_iota(jnp.int32, logits.shape, 1)        # [tile_b, O]
    masked = jnp.where(logits == max_val, col, jnp.int32(n_classes))
    preds = jnp.min(masked, axis=-1, keepdims=True)                   # [tile_b, 1]

    # Padded rows carry label = -1, so garbage boundary rows never count.
    correct = (preds == labels).astype(jnp.float32)                   # [tile_b, 1]
    count = jnp.sum(correct, keepdims=True)                           # [1, 1]

    # Add this (batch tile, model) correct-count into lane m of the resident,
    # lane-dense accumulator: one vreg of work per grid step.
    lane = jax.lax.broadcasted_iota(jnp.int32, out_ref.shape, 1)      # [1, M_pad]
    out_ref[...] += jnp.where(lane == m, count, jnp.float32(0.0))


def model_batched_accuracy(y_hat: jax.Array, y: jax.Array, *,
                           tile_b: int | None = None,
                           budget_bytes: int = 6 << 20) -> jax.Array:
    """y_hat: [M, B, O] float (any dtype), y: [B] int  ->  [M] float32 accuracies."""
    M, B, O = y_hat.shape
    itemsize = jnp.dtype(y_hat.dtype).itemsize

    m_pad = _round_up(M, 128)                     # lane-dense accumulator width
    o_pad = _round_up(O, 128)                     # VMEM lane padding of the class axis
    sub = {4: 8, 2: 16, 1: 32}.get(itemsize, 8)   # sublane multiple per dtype

    # Padded-layout VMEM bytes per batch row in one buffer:
    #   lane-padded logits row + lane-padded int32 label column row.
    row_bytes = o_pad * itemsize + 128 * 4

    if tile_b is None:
        max_rows = max(sub, (budget_bytes // row_bytes // sub) * sub)
        tile_b = B if B <= max_rows else max_rows
    tile_b = min(tile_b, B)
    if tile_b < B:
        tile_b = max(sub, (tile_b // sub) * sub)  # sublane-aligned partial tiles

    num_tiles = -(-B // tile_b)                   # cdiv
    b_pad = num_tiles * tile_b

    # Two-way split of the batch tiles so v7x's two TensorCores both run
    # (per-partition accumulator rows avoid any output race).  Only taken when
    # it divides exactly, so no logits block ever *starts* out of bounds.
    num_par = 2 if (num_tiles >= 2 and num_tiles % 2 == 0) else 1
    tiles_per_par = num_tiles // num_par

    labels = y.astype(jnp.int32).reshape(B)
    if b_pad > B:
        labels = jnp.pad(labels, (0, b_pad - B), constant_values=-1)
    labels = labels.reshape(b_pad, 1)

    # Explicit scoped-VMEM limit from the actual padded, double-buffered footprint.
    logits_buf = _round_up(tile_b, sub) * o_pad * itemsize
    labels_buf = _round_up(tile_b, 8) * 128 * 4
    out_buf = 8 * m_pad * 4
    vmem_need = 2 * (logits_buf + labels_buf + out_buf) + (4 << 20)   # + headroom
    vmem_limit = int(min(max(vmem_need, 8 << 20), 64 << 20))

    grid = (num_par, tiles_per_par, M)

    out = pl.pallas_call(
        _accuracy_kernel,
        out_shape=jax.ShapeDtypeStruct((num_par, m_pad), jnp.float32),
        grid=grid,
        in_specs=[
            # y_hat: model dim squeezed; labels block reused across the inner
            # model loop because its index map ignores m.
            pl.BlockSpec((None, tile_b, O),
                         lambda p, t, m: (m, p * tiles_per_par + t, 0)),
            pl.BlockSpec((tile_b, 1),
                         lambda p, t, m: (p * tiles_per_par + t, 0)),
        ],
        # One resident, lane-dense accumulator row per parallel chunk.
        out_specs=pl.BlockSpec((1, m_pad), lambda p, t, m: (p, 0)),
        compiler_params=pltpu.CompilerParams(
            dimension_semantics=("parallel", "arbitrary", "arbitrary"),
            vmem_limit_bytes=vmem_limit),
        cost_estimate=pl.CostEstimate(
            flops=5 * M * B * O,
            transcendentals=0,
            bytes_accessed=M * B * O * itemsize + b_pad * 4 + num_par * m_pad * 4),
    )(y_hat, labels)

    counts = jnp.sum(out, axis=0)[:M]             # fold the (tiny) partition rows
    return counts / jnp.float32(B)


def _reference(y_hat, y):
    preds = jnp.argmax(y_hat, axis=-1)            # [M, B]
    return jnp.mean((preds == y[None, :]).astype(jnp.float32), axis=-1)


if __name__ == "__main__":
    key = jax.random.PRNGKey(0)
    k1, k2 = jax.random.split(key)

    # Small shapes matching the module: n_models=3, batch=8, classes=32.
    M, B, O = 3, 8, 32
    y_hat = jax.random.normal(k1, (M, B, O), dtype=jnp.float32)
    y = jax.random.randint(k2, (B,), 0, O, dtype=jnp.int32)
    acc = jax.block_until_ready(model_batched_accuracy(y_hat, y))
    ref = _reference(y_hat, y)
    assert acc.shape == (M,), acc.shape
    assert jnp.allclose(acc, ref, atol=1e-6), (acc, ref)

    # Multi-tile path: 2-way parallel split, partial last tile, bf16, odd O.
    M2, B2, O2 = 5, 450, 40
    y_hat2 = jax.random.normal(k1, (M2, B2, O2), dtype=jnp.bfloat16)
    y2 = jax.random.randint(k2, (B2,), 0, O2, dtype=jnp.int32)
    acc2 = jax.block_until_ready(model_batched_accuracy(y_hat2, y2, tile_b=64))
    ref2 = _reference(y_hat2, y2)
    assert jnp.allclose(acc2, ref2, atol=1e-6), (acc2, ref2)

    # M > 128 exercises the lane-padded accumulator width.
    M3, B3, O3 = 130, 16, 8
    y_hat3 = jax.random.normal(k1, (M3, B3, O3), dtype=jnp.float32)
    y3 = jax.random.randint(k2, (B3,), 0, O3, dtype=jnp.int32)
    acc3 = jax.block_until_ready(model_batched_accuracy(y_hat3, y3))
    ref3 = _reference(y_hat3, y3)
    assert jnp.allclose(acc3, ref3, atol=1e-6), (acc3, ref3)

    print("KERNEL_OK")
</pallas_src>

<mosaic_0001>
module attributes {stable_mosaic.version = 11 : i64} {
  func.func @_accuracy_kernel(%arg0: i32, %arg1: i32, %arg2: i32, %arg3: memref<1x8x32xf32, #tpu.memory_space<vmem>>, %arg4: memref<8x1xi32, #tpu.memory_space<vmem>>, %arg5: memref<1x128xf32, #tpu.memory_space<vmem>>) attributes {dimension_semantics = [#tpu.dimension_semantics<parallel>, #tpu.dimension_semantics<arbitrary>, #tpu.dimension_semantics<arbitrary>], iteration_bounds = array<i64: 1, 1, 3>, scalar_prefetch = 0 : i64, scratch_operands = 0 : i64, tpu.core_type = #tpu.core_type<tc>, window_params = [{transform_indices = @transform_0, window_bounds = array<i64: 1, 8, 32>}, {transform_indices = @transform_1, window_bounds = array<i64: 8, 1>}, {transform_indices = @transform_2, window_bounds = array<i64: 1, 128>}]} {
    %c0_i32 = arith.constant 0 : i32
    %0 = arith.cmpi eq, %arg1, %c0_i32 : i32
    %c0_i32_0 = arith.constant 0 : i32
    %1 = arith.cmpi eq, %arg2, %c0_i32_0 : i32
    %2 = arith.andi %0, %1 : i1
    %3 = arith.extui %2 : i1 to i32
    %c0_i32_1 = arith.constant 0 : i32
    %4 = arith.cmpi ne, %3, %c0_i32_1 : i32
    scf.if %4 {
      %cst_13 = arith.constant 0.000000e+00 : f32
      %35 = vector.broadcast %cst_13 : f32 to vector<1x128xf32>
      %c0_14 = arith.constant 0 : index
      %c0_15 = arith.constant 0 : index
      %36 = vector.load %arg5[%c0_14, %c0_15] : memref<1x128xf32, #tpu.memory_space<vmem>>, vector<1x128xf32>
      tpu.vector_store %arg5[%c0_14, %c0_15], %35 {strides = array<i32>} : memref<1x128xf32, #tpu.memory_space<vmem>>, vector<1x128xf32>,
    } else {
    }
    %c0 = arith.constant 0 : index
    %c0_2 = arith.constant 0 : index
    %c0_3 = arith.constant 0 : index
    %5 = vector.load %arg3[%c0, %c0_2, %c0_3] : memref<1x8x32xf32, #tpu.memory_space<vmem>>, vector<1x8x32xf32>
    %6 = vector.shape_cast %5 : vector<1x8x32xf32> to vector<8x32xf32>
    %c0_4 = arith.constant 0 : index
    %c0_5 = arith.constant 0 : index
    %7 = vector.load %arg4[%c0_4, %c0_5] : memref<8x1xi32, #tpu.memory_space<vmem>>, vector<8x1xi32>
    %cst = arith.constant dense<0xFF800000> : vector<8xf32>
    %8 = vector.multi_reduction <maximumf>, %6, %cst [1] : vector<8x32xf32> to vector<8xf32>
    %9 = vector.shape_cast %8 : vector<8xf32> to vector<8x1xf32>
    %10 = tpu.iota {dimensions = array<i32: 1>} : vector<8x32xi32>
    %11 = vector.broadcast %9 : vector<8x1xf32> to vector<8x32xf32>
    %12 = arith.cmpf oeq, %6, %11 : vector<8x32xf32>
    %c32_i32 = arith.constant 32 : i32
    %13 = vector.broadcast %c32_i32 : i32 to vector<8x32xi32>
    %14 = arith.select %12, %10, %13 : vector<8x32xi1>, vector<8x32xi32>
    %cst_6 = arith.constant dense<2147483647> : vector<8xi32>
    %15 = vector.multi_reduction <minsi>, %14, %cst_6 [1] : vector<8x32xi32> to vector<8xi32>
    %16 = vector.shape_cast %15 : vector<8xi32> to vector<8x1xi32>
    %17 = arith.cmpi eq, %16, %7 : vector<8x1xi32>
    %18 = arith.extui %17 : vector<8x1xi1> to vector<8x1xi32>
    %19 = arith.sitofp %18 : vector<8x1xi32> to vector<8x1xf32>
    %20 = vector.shape_cast %19 : vector<8x1xf32> to vector<1x8x1xf32>
    %cst_7 = arith.constant dense<0.000000e+00> : vector<1xf32>
    %21 = vector.multi_reduction <add>, %20, %cst_7 [1, 2] : vector<1x8x1xf32> to vector<1xf32>
    %22 = vector.shape_cast %21 : vector<1xf32> to vector<1x1x1xf32>
    %23 = vector.extract %22[0, 0, 0] : f32 from vector<1x1x1xf32>
    %24 = vector.broadcast %23 : f32 to vector<1x1xf32>
    %25 = tpu.iota {dimensions = array<i32: 1>} : vector<1x128xi32>
    %c0_8 = arith.constant 0 : index
    %c0_9 = arith.constant 0 : index
    %26 = vector.load %arg5[%c0_8, %c0_9] : memref<1x128xf32, #tpu.memory_space<vmem>>, vector<1x128xf32>
    %27 = vector.broadcast %arg2 : i32 to vector<1x128xi32>
    %28 = arith.cmpi eq, %25, %27 : vector<1x128xi32>
    %cst_10 = arith.constant 0.000000e+00 : f32
    %29 = vector.shape_cast %24 : vector<1x1xf32> to vector<1x1xf32>
    %30 = vector.broadcast %29 : vector<1x1xf32> to vector<1x128xf32>
    %31 = vector.broadcast %cst_10 : f32 to vector<1x128xf32>
    %32 = arith.select %28, %30, %31 : vector<1x128xi1>, vector<1x128xf32>
    %33 = arith.addf %26, %32 : vector<1x128xf32>
    %c0_11 = arith.constant 0 : index
    %c0_12 = arith.constant 0 : index
    %34 = vector.load %arg5[%c0_11, %c0_12] : memref<1x128xf32, #tpu.memory_space<vmem>>, vector<1x128xf32>
    tpu.vector_store %arg5[%c0_11, %c0_12], %33 {strides = array<i32>} : memref<1x128xf32, #tpu.memory_space<vmem>>, vector<1x128xf32>,
    return
  }
  func.func @transform_0(%arg0: i32, %arg1: i32, %arg2: i32) -> (i32, i32, i32) {
    %c1_i32 = arith.constant 1 : i32
    %0 = arith.muli %arg0, %c1_i32 : i32
    %1 = arith.addi %0, %arg1 : i32
    %c0_i32 = arith.constant 0 : i32
    %c0_i32_0 = arith.constant 0 : i32
    return %arg2, %1, %c0_i32 : i32, i32, i32
  }
  func.func @transform_1(%arg0: i32, %arg1: i32, %arg2: i32) -> (i32, i32) {
    %c1_i32 = arith.constant 1 : i32
    %0 = arith.muli %arg0, %c1_i32 : i32
    %1 = arith.addi %0, %arg1 : i32
    %c0_i32 = arith.constant 0 : i32
    %c0_i32_0 = arith.constant 0 : i32
    return %1, %c0_i32 : i32, i32
  }
  func.func @transform_2(%arg0: i32, %arg1: i32, %arg2: i32) -> (i32, i32) {
    %c0_i32 = arith.constant 0 : i32
    %c0_i32_0 = arith.constant 0 : i32
    return %arg0, %c0_i32 : i32, i32
  }
}

</mosaic_0001>

<bundles_post_ra>
// kernel: tpu_custom_call.1
= control target key start
LH: loop header
LB: loop body
LE: loop exit
PB: predicated region body
PF: predicated region fallthrough
CT: control target
= control target key end

     0   :  { %7 = vsyncpa [#allocation3], 0  ;;  %s712_s0 = inlined_call_operand.hbm [shape: f32[3,8,32], index: 0, kind: input, shape index: {}]   ;;  %s713_s1 = inlined_call_operand.vmem [shape: s32[8,1], index: 1, kind: input, shape index: {}]   ;;  %s714_s2 = inlined_call_operand.hbm [shape: f32[1,128], index: 2, kind: output, shape index: {}]  }
   0x1   :  { %9 = vsyncpa [#allocation3 + $0x1], 0 }
   0x2   :  { %10 = vsyncpa [#allocation4], 0  ;;  %s557_s9 = smov 0   ;;  %s559_s10 = smov 0  }
   0x3   :  { %s561_s11 = smov 0   ;;  %s563_s12 = smov 0  }
   0x4   :  { %s565_s13 = smov 0   ;;  %s567_s14 = smov 0  }
   0x5 LB: > { %s345_s15 = sadd.s32 4294967295, %s536_s14   ;;  %s28_s16 = sadd.s32 1, %s532_s13  ;;  %s536_s14 = sphi %s567_s14, %s16_s14   ;;  %s532_s13 = sphi %s565_s13, %s725_s13   ;;  %s528_s12 = sphi %s563_s12, %s724_s12   ;;  %s524_s11 = sphi %s561_s11, %s723_s11   ;;  %s520_s10 = sphi %s559_s10, %s722_s10   ;;  %s516_s9 = sphi %s557_s9, %s721_s9  }
   0x6   : > { %p29_p0 = scmp.ge.s32.totalorder %s28_s16, 3  ;;  %s46_s17 = sadd.s32 1, %s524_s11 }
   0x7   : > { %p53_p1 = scmp.ne.s32.totalorder %s524_s11, %s520_s10  ;;  %p54_p2 = scmp.eq.s32.totalorder %s536_s14, 0 }
   0x8   : > { %s727_s16 = smov (%p29_p0, %s28_s16), 0  ;;  %p59_p4 = scmp.ne.s32.totalorder %s520_s10, %s516_s9 }
   0x9   : > { %p593_p3 = por %p54_p2, %p53_p1  ;;  %s41_s19 = ssub.s32 %s532_s13, %s727_s16 }
   0xa   : > { %p60_p5 = scmp.eq.s32.totalorder %s345_s15, 0  ;;  %p44_p6 = scmp.eq.s32.totalorder %s41_s19, 0 }
   0xb   : > { %p372_p8 = scmp.lt.s32.totalorder %s536_s14, 3  ;;  %s146_s22 = sand.u32 1, %s524_s11  }
   0xc   : > { %p602_p7 = por %p60_p5, %p59_p4  ;;  %s350_s23 = sshll.u32 %s532_s13, 7 }
   0xd   : > { %s608_s21 = scalar_select %p44_p6, %s524_s11, %s46_s17  }
   0xe   : > { %s349_s24 = sshll.u32 %s146_s22, 3  ;;  %s615_s27 = scalar_lea.hbm %s712_s0, %s350_s23 }
   0xf   : > { %s150_s28 = scalar_lea.vmem [#allocation2], %s349_s24  ;;  %p619_p9 = pnand %p372_p8, %p593_p3 }
  0x10   : > { %s159_s29 = sshll.u32 %s150_s28, 4  ;;  %s147_s3 = scalar_lea.sflag [#allocation3], %s146_s22  ;;  %s623_s29 = int_to_ptr.vmem [resolvable:$true] %s159_s29 }
  0x11   : > { %s426_s4 = scalar_lea.hbm %s615_s27, 128  ;;  %p428_p13 = pneg %p619_p9 }
  0x12   : > { %p427_p12 = scmp.ne.s32.totalorder %s615_s27, %s426_s4  ;;  %s431_s7 = scalar_lea.hbm %s712_s0, 384 }
  0x13   : > { %p432_p2 = scmp.lt.u32.totalorder %s615_s27, %s712_s0  ;;  %p433_p3 = scmp.lt.u32.totalorder %s431_s7, %s426_s4 }
  0x14   : > { %p429_p0 = pnand %p428_p13, %p427_p12  ;;  %p435_p5 = scmp.lt.u32.totalorder %s426_s4, %s615_s27 }
  0x15   : > { %p434_p4 = por %p433_p3, %p432_p2 }
  0x16   : > { %p430_p1 = pneg %p429_p0 }
  0x17   : > { %p436_p6 = por %p435_p5, %p434_p4 }
  0x19   : > { %p437_p8 = pnand %p436_p6, %p430_p1 }
  0x1b   : > { %440 = shalt.err (!%p437_p8)
}
  0x1c   : > { %s441_s17 = scalar_lea.vmem %s623_s29, 128  ;;  %s538_s18 = smov [#allocation2]  }
  0x1d   : > { %p442_p12 = scmp.ne.s32.totalorder %s623_s29, %s441_s17  ;;  %s446_s19 = sshll.u32 %s538_s18, 4  ;;  %s447_s19 = int_to_ptr.vmem [resolvable:$false] %s446_s19 }
  0x1e   : > { %s448_s22 = scalar_lea.vmem %s447_s19, 256  ;;  %p449_p11 = scmp.lt.s32.totalorder %s623_s29, %s447_s19 }
  0x1f   : > { %p444_p0 = pnand %p442_p12, %p428_p13  ;;  %p450_p2 = scmp.lt.s32.totalorder %s448_s22, %s441_s17 }
  0x21   : > { %p445_p10 = pneg %p444_p0  ;;  %p451_p3 = por %p450_p2, %p449_p11 }
  0x23   : > { %p452_p4 = pnand %p451_p3, %p445_p10 }
  0x25   : > { %455 = shalt.err (!%p452_p4)
}
  0x26   : > { %371 = dma.hbm_to_vmem [thread:$0]  (!%p619_p9), %s615_s27, 128, %s623_s29, %s147_s3  }
  0x27   : > { %p718_p1 = scmp.lt.s32.totalorder %s536_s14, 4  ;;  %p719_p5 = scmp.ge.s32.totalorder %s536_s14, 1 }
  0x29   : > { %p165_p13 = pnand %p719_p5, %p718_p1 }
  0x2a   : > { %s170_s23 = sand.u32 (!%p165_p13), 1, %s520_s10  }
  0x2b   : > { %168 = sbr.rel (%p165_p13) target bundleno = 727 (0x2d7), region = 28  ;;  %s352_s24 = sshll.u32 (!%p165_p13), %s170_s23, 3 }
  0x2c   : > { %s171_s25 = scalar_lea.sflag (!%p165_p13), [#allocation3], %s170_s23  ;;  %s174_s26 = scalar_lea.vmem (!%p165_p13), [#allocation2], %s352_s24 }
  0x32   : > { %507 = dma.done.wait (%p602_p7), %s171_s25, 128  }
  0x33   : > { %509 = vsyncadd (%p602_p7), %s171_s25, 4294967168  ;;  %p203_p10 = scmp.eq.s32.totalorder %s528_s12, 0 }
  0x34   : > { %v539_v0 = vmov (%p203_p10), 0.0  }
  0x35   : > { %207 = sbr.rel (!%p203_p10) target bundleno = 60 (0x3c), region = 36  ;;  %208 = vst [vmem:[#allocation5] sm:$0x1] (%p203_p10), %v539_v0 }
  0x3c PF: > { %v209_v1 = vld [vmem:[%s174_s26] sm:$0xff]  ;;  %vm211_vm0 = vcmask 261120   ;;  %v215_v3 = vlaneseq  ;;  %vm237_vm3 = vcmask 7168   ;;  %v540_v20 = vmov 0.0   ;;  %v248_v31 = vld [vmem:[#allocation5] sm:$0x1] }
  0x3d   : > { %v212_v2 = vsel %vm211_vm0, %v209_v1, -inf  ;;  %v210_v18 = vld [vmem:[%s713_s1] sm:$0xff]  ;;  %v249_v30 = vstv %s528_s12  ;;  %s541_s29 = smov [#allocation5]   ;;  %p668_p7 = scmp.eq.s32.totalorder %s345_s15, 2 }
  0x3e   : > { %213 = vmax.xlane.f32.xlu0 %v212_v2  ;;  %v216_v4 = vand.u32 127, %v215_v3  ;;  %s264_s30 = sshll.u32 %s541_s29, 4  ;;  %s265_s30 = int_to_ptr.vmem [resolvable:$true] %s264_s30 }
  0x3f   : > { %s456_s4 = scalar_lea.vmem %s265_s30, 16  ;;  %s462_s12 = scalar_lea.vmem %s265_s30, 32 }
  0x40   : > { %vm250_vm5 = vcmp.eq.s32.totalorder %v216_v4, %v249_v30  ;;  %p457_p9 = scmp.ne.s32.totalorder %s265_s30, %s456_s4  ;;  %p463_p8 = scmp.lt.s32.totalorder %s265_s30, %s265_s30 }
  0x41   : > { %p464_p12 = scmp.lt.s32.totalorder %s462_s12, %s456_s4 }
  0x42   : > { %p458_p11 = pnand %p457_p9, %p668_p7 }
  0x43   : > { %p465_p0 = por %p464_p12, %p463_p8 }
  0x44   : > { %p459_p6 = pneg %p458_p11 }
  0x46   : > { %p466_p2 = pnand %p465_p0, %p459_p6 }
  0xcb   : > { %v214_v5 = vpop.xlane.xlu0 %213 }
  0xcc   : > { %vm217_vm1 = vcmp.eq.f32.partialorder %v209_v1, %v214_v5 }
  0xcd   : > { %v218_v6 = vsel %vm217_vm1, %v216_v4, 32 }
  0xce   : > { %v219_v7 = vsel %vm211_vm0, %v218_v6, 2147483647 }
  0xcf   : > { %v221_v8 = vshra.s32 %v219_v7, 16  ;;  %v220_v10 = vand.u32 65535, %v219_v7 }
  0xd1   : > { %v223_v9 = vcvt.s32.f32 %v221_v8  ;;  %v222_v12 = vcvt.s32.f32 %v220_v10 }
  0xd3   : > { %224 = vmin.xlane.f32.xlu0 %v223_v9 }
 0x160   : > { %v225_v11 = vpop.xlane.xlu0 %224 }
 0x161   : > { %vm226_vm2 = vcmp.eq.f32.partialorder %v223_v9, %v225_v11  ;;  %v231_v14 = vcvt.f32.s32 %v225_v11 }
 0x162   : > { %v227_v13 = vsel %vm226_vm2, %v222_v12, inf }
 0x163   : > { %228 = vmin.xlane.f32.xlu1 %v227_v13  ;;  %v232_v16 = vshll.u32 %v231_v14, 16 }
 0x1f0   : > { %v229_v15 = vpop.xlane.xlu1 %228 }
 0x1f1   : > { %v230_v17 = vcvt.f32.s32 %v229_v15 }
 0x1f3   : > { %v233_v19 = vadd.s32 %v232_v16, %v230_v17 }
 0x1f5   : > { %vm234_vm4 = vcmp.eq.s32.totalorder %v233_v19, %v210_v18 }
 0x1f6   : > { %v354_v21 = vsel %vm234_vm4, 1.0, %v540_v20 }
 0x1f7   : > { %v238_v22 = vsel %vm237_vm3, %v354_v21, 0.0 }
 0x1f8   : > { %239 = vadd.xlane.f32.xlu1 %v238_v22 }
 0x285   : > { %v240_v23 = vpop.xlane.xlu1 %239 }
 0x286   : > { %v241_v24 = vrot.slane %v240_v23, 4 }
 0x288   : > { %v242_v25 = vadd.f32 %v241_v24, %v240_v23 }
 0x28a   : > { %v243_v26 = vrot.slane %v242_v25, 2 }
 0x28c   : > { %v244_v27 = vadd.f32 %v243_v26, %v242_v25 }
 0x28e   : > { %v245_v28 = vrot.slane %v244_v27, 1 }
 0x290   : > { %v246_v29 = vadd.f32 %v245_v28, %v244_v27 }
 0x292   : > { %360 = vpush %v246_v29 }
 0x2c3   : > { %s361_s28 = spop %360 }
 0x2c4   : > { %v251_v32 = vstv %s361_s28 }
 0x2c5   : > { %v252_v33 = vsel %vm250_vm5, %v251_v32, 0.0 }
 0x2c6   : > { %v253_v34 = vadd.f32 %v252_v33, %v248_v31 }
 0x2c8   : > { %254 = vst [vmem:[#allocation5] sm:$0x1] %v253_v34 }
 0x2c9   : > { %469 = shalt.err (!%p466_p2)
}
 0x2ca   : > { %s470_s6 = scalar_lea.hbm %s714_s2, 16 }
 0x2cb   : > { %p471_p3 = scmp.ne.s32.totalorder %s714_s2, %s470_s6  ;;  %p476_p5 = scmp.lt.u32.totalorder %s470_s6, %s714_s2 }
 0x2cd   : > { %p472_p4 = pnand %p471_p3, %p668_p7 }
 0x2cf   : > { %p473_p1 = pneg %p472_p4 }
 0x2d1   : > { %p478_p13 = pnand %p476_p5, %p473_p1 }
 0x2d3   : > { %481 = shalt.err (!%p478_p13)
}
 0x2d4   : > { %365 = dma.vmem_to_hbm [thread:$0]  (%p668_p7), %s265_s30, 16, %s714_s2, [#allocation4]  }
 0x2d5   : > { %511 = dma.done.wait (%p668_p7), [#allocation4], 16  }
 0x2d6   : > { %513 = vsyncadd (%p668_p7), [#allocation4], 4294967280 }
 0x2d7 PF: > { %s16_s14 = sadd.s32 1, %s536_s14   ;;  %s721_s9 = smov %s520_s10 }
 0x2d8   : > { %p13_p10 = scmp.ge.s32.totalorder %s16_s14, 5   ;;  %s722_s10 = smov %s524_s11 }
 0x2d9   : > { %s723_s11 = smov %s608_s21  ;;  %s724_s12 = smov %s532_s13 }
 0x2da   : > { %s725_s13 = smov %s727_s16  ;;  %15 = sbr.rel (!%p13_p10) target bundleno = 5 (0x5), region = 73 }
 0x2e1   :  { %277 = vsyncpa [#allocation3], 1 }
 0x2e2   :  { %279 = vsyncpa [#allocation3 + $0x1], 1 }
 0x2e3   :  { %280 = vsyncpa [#allocation4], 1 }
 0x2e4   :  { %282 = vsyncpa [#allocation4 + $0x1], 1 }

</bundles_post_ra>
